<compile_context>
chip_gen: v7x
topology: tpu7x:2x2x1
jax: 0.10.0
libtpu: 0.0.40
codegen_flags: <defaults>
</compile_context>

<pallas_src>
import functools

import jax
import jax.numpy as jnp
from jax.experimental import pallas as pl
from jax.experimental.pallas import tpu as pltpu


# ----------------------------------------------------------------------------------
# Generation-aware tiling configuration
# ----------------------------------------------------------------------------------
def _round_up(x, m):
    return ((x + m - 1) // m) * m


def _tpu_vmem_capacity_bytes():
    """Per-TensorCore VMEM capacity; conservative (v7x = 64 MiB) fallback."""
    try:
        info = pltpu.get_tpu_info()
        for attr in ("vmem_capacity_bytes", "vmem_size_bytes", "vmem_bytes"):
            v = getattr(info, attr, None)
            if v:
                return int(v)
    except Exception:
        pass
    return 64 * 1024 * 1024


_VMEM_CAP = _tpu_vmem_capacity_bytes()
if _VMEM_CAP >= 100 * 1024 * 1024:
    # v5e / v6e: 128 MiB VMEM per TC -> big streaming tiles (B double-buffer ~64 MB).
    _REMAP_TK = 8192
    _REMAP_TN = 2048
    _REMAP_VMEM_LIMIT = min(100 * 1024 * 1024, _VMEM_CAP - 16 * 1024 * 1024)
else:
    # v7x: 64 MiB VMEM per TC -> keep the double-buffered B tile at ~16 MB.
    _REMAP_TK = 4096
    _REMAP_TN = 1024
    _REMAP_VMEM_LIMIT = 48 * 1024 * 1024


# ----------------------------------------------------------------------------------
# Tiled matmul Pallas kernels (f32 VMEM accumulator over the K grid axis)
# ----------------------------------------------------------------------------------
def _mm_kernel(a_ref, b_ref, o_ref, acc_ref):
    @pl.when(pl.program_id(2) == 0)
    def _():
        acc_ref[...] = jnp.zeros_like(acc_ref)

    acc_ref[...] += jnp.dot(a_ref[...], b_ref[...],
                            preferred_element_type=jnp.float32)

    @pl.when(pl.program_id(2) == pl.num_programs(2) - 1)
    def _():
        o_ref[...] = acc_ref[...].astype(o_ref.dtype)


def _mm_kernel_lhs_resident(a_ref, b_ref, o_ref, acc_ref, *, tk):
    # a_ref holds the FULL (tm, Kp) row-panel of A; its block index only depends on the
    # (outermost) M grid axis, so the small LHS is DMA'd once per M block instead of
    # being re-streamed from HBM for every N tile.
    k = pl.program_id(2)

    @pl.when(k == 0)
    def _():
        acc_ref[...] = jnp.zeros_like(acc_ref)

    off = pl.multiple_of(k * tk, 128)
    acc_ref[...] += jnp.dot(a_ref[:, pl.ds(off, tk)], b_ref[...],
                            preferred_element_type=jnp.float32)

    @pl.when(k == pl.num_programs(2) - 1)
    def _():
        o_ref[...] = acc_ref[...].astype(o_ref.dtype)


def _pick_tile(dim, quantum, max_tile):
    """Largest tile <= max_tile (multiple of quantum) dividing round_up(dim, quantum)."""
    base = _round_up(dim, quantum)
    if base <= max_tile:
        return base
    for cand in range(max_tile, quantum - 1, -quantum):
        if base % cand == 0:
            return cand
    return quantum


def pallas_matmul(a, b, *, out_dtype=jnp.float32,
                  max_tm=256, max_tk=_REMAP_TK, max_tn=_REMAP_TN,
                  lhs_resident=False,
                  vmem_limit_bytes=_REMAP_VMEM_LIMIT):
    """Tiled (M,K) @ (K,N) -> (M,N) in out_dtype.

    Operands stream in their given dtype (call sites pass bf16 for the HBM-bound remap
    weights); accumulation is always f32 in a VMEM scratch.  M/N grid axes are
    "parallel" (megacore / 2-TC sharding); K is innermost "arbitrary".  Tile caps and
    the VMEM limit are generation-dependent (see module-level config).  tm stays small
    on purpose: the remaps are HBM-bound, so idle MXU rows are free.

    lhs_resident=True keeps the whole (tm, Kp) row-panel of A in VMEM and slices it over
    K inside the kernel -- use when A is small (cs->ll remap: ~1-2 MB).
    """
    M, K = a.shape
    K2, N = b.shape
    assert K == K2, (a.shape, b.shape)

    tm = _pick_tile(M, 8, max_tm)
    tn = _pick_tile(N, 128, max_tn)
    # Small contraction dims: span the full K (a block may legally equal the full
    # array dim) instead of zero-padding both operands up to 128.
    tk = K if K < 128 else _pick_tile(K, 128, max_tk)

    Mp, Kp, Np = _round_up(M, tm), _round_up(K, tk), _round_up(N, tn)
    if (Mp, Kp) != (M, K):
        a = jnp.pad(a, ((0, Mp - M), (0, Kp - K)))
    if (Kp, Np) != (K, N):
        b = jnp.pad(b, ((0, Kp - K), (0, Np - N)))

    lhs_resident = lhs_resident and (tk % 128 == 0)
    if lhs_resident:
        a_spec = pl.BlockSpec((tm, Kp), lambda i, j, k: (i, 0))
        kernel = functools.partial(_mm_kernel_lhs_resident, tk=tk)
    else:
        a_spec = pl.BlockSpec((tm, tk), lambda i, j, k: (i, k))
        kernel = _mm_kernel

    out = pl.pallas_call(
        kernel,
        out_shape=jax.ShapeDtypeStruct((Mp, Np), out_dtype),
        grid=(Mp // tm, Np // tn, Kp // tk),
        in_specs=[a_spec,
                  pl.BlockSpec((tk, tn), lambda i, j, k: (k, j))],
        out_specs=pl.BlockSpec((tm, tn), lambda i, j, k: (i, j)),
        scratch_shapes=[pltpu.VMEM((tm, tn), jnp.float32)],
        compiler_params=pltpu.CompilerParams(
            dimension_semantics=("parallel", "parallel", "arbitrary"),
            vmem_limit_bytes=vmem_limit_bytes,
        ),
    )(a, b)

    if (Mp, Np) != (M, N):
        out = out[:M, :N]
    return out


# ----------------------------------------------------------------------------------
# Dedicated 1x1-conv (channel mixing) kernel: one lane-dense block per batch element
# ----------------------------------------------------------------------------------
def _conv1x1_kernel(x_ref, w_ref, b_ref, o_ref):
    # (c_out, c_in) @ (c_in, P) + bias; P = 6*F*F (multiple of 128) -> lane-dense store.
    y = jnp.dot(w_ref[...], x_ref[0], preferred_element_type=jnp.float32)
    o_ref[0] = (y + b_ref[...]).astype(o_ref.dtype)


def pallas_conv1x1(x, w, b):
    """x: (bs, c_in, P); w: (c_out, c_in); b: (c_out,) -> (bs, c_out, P) f32.

    The op moves only a few MB, so a tiled launch would be pure per-step overhead
    (review item): the whole face-pixel axis is one block, grid is just the batch.
    Also avoids the (c_in, bs*P) transpose materializations of the generic path.
    """
    bs, c_in, P = x.shape
    c_out = w.shape[0]
    bias = b.reshape(c_out, 1).astype(jnp.float32)
    return pl.pallas_call(
        _conv1x1_kernel,
        out_shape=jax.ShapeDtypeStruct((bs, c_out, P), jnp.float32),
        grid=(bs,),
        in_specs=[
            pl.BlockSpec((1, c_in, P), lambda i: (i, 0, 0)),
            pl.BlockSpec((c_out, c_in), lambda i: (0, 0)),
            pl.BlockSpec((c_out, 1), lambda i: (0, 0)),
        ],
        out_specs=pl.BlockSpec((1, c_out, P), lambda i: (i, 0, 0)),
        compiler_params=pltpu.CompilerParams(
            dimension_semantics=("parallel",),
        ),
    )(x.astype(jnp.float32), w.astype(jnp.float32), bias)


# ----------------------------------------------------------------------------------
# Glue (plain JAX): solar geometry stand-in, vectorized over time steps
# ----------------------------------------------------------------------------------
def cos_zenith_angle(time_hours, lon_deg, lat_deg):
    lat = jnp.deg2rad(lat_deg)
    lon = jnp.deg2rad(lon_deg)
    day = time_hours / 24.0
    decl = jnp.deg2rad(23.45) * jnp.sin(2.0 * jnp.pi * (day % 365.25) / 365.25)
    hour_angle = 2.0 * jnp.pi * (day % 1.0) + lon - jnp.pi
    return (jnp.sin(lat) * jnp.sin(decl)
            + jnp.cos(lat) * jnp.cos(decl) * jnp.cos(hour_angle))


# ----------------------------------------------------------------------------------
# The wrapper
# ----------------------------------------------------------------------------------
class DLWPWrapperPallas:
    channel_names = ["t850", "z1000", "z700", "z500", "z300", "tcwv", "t2m"]

    def __init__(self, model_w, model_b, lsm, longrid, latgrid,
                 topographic_height, ll_to_cs_map, cs_to_ll_map, face_res):
        self.model_w = jnp.asarray(model_w, jnp.float32)    # (C_out, C_in)
        self.model_b = jnp.asarray(model_b, jnp.float32)    # (C_out,)
        self.lsm = jnp.asarray(lsm, jnp.float32)             # (1, 6, F, F)
        self.longrid = jnp.asarray(longrid, jnp.float32)     # (6, F, F)
        self.latgrid = jnp.asarray(latgrid, jnp.float32)     # (6, F, F)
        self.topographic_height = jnp.asarray(topographic_height, jnp.float32)
        self.F = face_res

        N_cs, N_ll = ll_to_cs_map.shape
        self.N_cs, self.N_ll = N_cs, N_ll
        self.N_cs_pad = _round_up(N_cs, 128)
        self.N_ll_pad = _round_up(N_ll, 128)

        # Store the remap weights pre-transposed, in bf16, lane/sublane padded ONCE.
        # (Avoids a per-call HBM transpose + pad copy of the big densified
        #  interpolation matrices at production size.)
        m_in_t = jnp.asarray(ll_to_cs_map).T.astype(jnp.bfloat16)     # (N_ll, N_cs)
        self.M_in_T = jnp.pad(m_in_t, ((0, self.N_ll_pad - N_ll),
                                       (0, self.N_cs_pad - N_cs)))
        m_out_t = jnp.asarray(cs_to_ll_map).T.astype(jnp.bfloat16)    # (N_cs, N_ll)
        self.M_out_T = jnp.pad(m_out_t, ((0, self.N_cs_pad - N_cs),
                                         (0, self.N_ll_pad - N_ll)))

    # -------------------------- prepare_input -----------------------------------
    def prepare_input(self, x, time_hours):
        F = self.F
        bs, t, chan = x.shape[0], x.shape[1], x.shape[2]
        N_ll = x.shape[3] * x.shape[4]

        # lat-lon -> cubed-sphere remap (HBM-bound): bf16 streams, f32 accumulate.
        # Cast + pad in one producer so XLA fuses them into a single copy.
        x2 = jnp.pad(x.reshape(bs * t * chan, N_ll).astype(jnp.bfloat16),
                     ((0, 0), (0, self.N_ll_pad - N_ll)))
        x_cs = pallas_matmul(x2, self.M_in_T)[:, :self.N_cs]   # (bs*t*chan, N_cs) f32
        x_cs = x_cs.reshape(bs, t, chan, 6, F, F)

        # Solar forcing for all t steps in one shot (plain jnp, fused by XLA).
        # NOTE: offsets by input.shape[0] (= bs), exactly as the reference module does.
        ti = time_hours - 6.0 * (bs - 1) + 6.0 * jnp.arange(t, dtype=jnp.float32)
        cosz = cos_zenith_angle(ti[:, None, None, None],
                                self.longrid[None], self.latgrid[None])   # (t,6,F,F)
        tisr = jnp.maximum(cosz, 0.0) - (1.0 / jnp.pi)
        tisr = jnp.broadcast_to(tisr[None, :, None], (bs, t, 1, 6, F, F))

        # Interleave [chan data channels, tisr] per time step with a single concat.
        stacked = jnp.concatenate([x_cs, tisr], axis=2)        # (bs, t, chan+1, 6,F,F)
        input_model = stacked.reshape(bs, t * (chan + 1), 6, F, F)

        lsm = jnp.broadcast_to(self.lsm[None], (bs, 1, 6, F, F))
        topo = (self.topographic_height - 3724.0) / 8349.0
        topo = jnp.broadcast_to(topo[None], (bs, 1, 6, F, F))
        return jnp.concatenate([input_model, lsm, topo], axis=1)  # (bs, t*(chan+1)+2, 6,F,F)

    # -------------------------- model (stand-in) --------------------------------
    def model(self, x):
        F = self.F
        bs, c_in = x.shape[0], x.shape[1]
        P = 6 * F * F
        y = pallas_conv1x1(x.reshape(bs, c_in, P), self.model_w, self.model_b)
        return y.reshape(bs, -1, 6, F, F)

    # -------------------------- prepare_output ----------------------------------
    def prepare_output(self, output, nlat, nlon):
        bs, c = output.shape[0], output.shape[1]
        half = c // 2
        N_ll = nlat * nlon
        out2 = jnp.pad(output.reshape(bs * c, -1).astype(jnp.bfloat16),
                       ((0, 0), (0, self.N_cs_pad - self.N_cs)))
        # Small LHS (bs*c rows) stays VMEM-resident across the N tiles of the big map.
        out_ll = pallas_matmul(out2, self.M_out_T,
                               lhs_resident=True)[:, :N_ll]     # (rows, N_ll) f32
        return out_ll.reshape(bs, 2, half, nlat, nlon)

    # -------------------------- forward ------------------------------------------
    def forward(self, x, time_hours, nlat, nlon):
        xin = self.prepare_input(x, time_hours)
        y = self.model(xin)
        return self.prepare_output(y, nlat, nlon)


# ----------------------------------------------------------------------------------
# Pure f32 jnp reference (validates the bf16-streaming Pallas path)
# ----------------------------------------------------------------------------------
def reference_forward(x, time_hours, M_in, M_out, W, b, lsm, longrid, latgrid,
                      topo, F, nlat, nlon):
    bs, t, chan = x.shape[0], x.shape[1], x.shape[2]
    N_ll = nlat * nlon
    x_cs = (x.reshape(bs * t * chan, N_ll) @ M_in.T).reshape(bs, t, chan, 6, F, F)

    ti = time_hours - 6.0 * (bs - 1) + 6.0 * jnp.arange(t, dtype=jnp.float32)
    cosz = cos_zenith_angle(ti[:, None, None, None], longrid[None], latgrid[None])
    tisr = jnp.maximum(cosz, 0.0) - (1.0 / jnp.pi)
    tisr = jnp.broadcast_to(tisr[None, :, None], (bs, t, 1, 6, F, F))

    stacked = jnp.concatenate([x_cs, tisr], axis=2).reshape(bs, t * (chan + 1), 6, F, F)
    lsm_b = jnp.broadcast_to(lsm[None], (bs, 1, 6, F, F))
    topo_b = jnp.broadcast_to(((topo - 3724.0) / 8349.0)[None], (bs, 1, 6, F, F))
    xin = jnp.concatenate([stacked, lsm_b, topo_b], axis=1)     # (bs, C_in, 6,F,F)

    P = 6 * F * F
    y = jnp.einsum("oi,bip->bop", W, xin.reshape(bs, -1, P)) + b[None, :, None]

    c_out = y.shape[1]
    out = (y.reshape(bs * c_out, -1) @ M_out.T)
    return out.reshape(bs, 2, c_out // 2, nlat, nlon)


# ----------------------------------------------------------------------------------
if __name__ == "__main__":
    key = jax.random.PRNGKey(0)
    keys = jax.random.split(key, 10)

    bs, t, chan = 2, 2, 7            # 7 = len(channel_names)
    nlat, nlon = 9, 16               # small lat-lon grid (real: 721 x 1440)
    F = 8                            # cubed-sphere face resolution (real: 64)
    N_ll = nlat * nlon
    N_cs = 6 * F * F

    # inputs
    x = jax.random.normal(keys[0], (bs, t, chan, nlat, nlon), jnp.float32)
    time_hours = 123456.0            # deterministic stand-in for a datetime

    # dense stand-ins for the sparse COO interpolation weights (rows sum to 1)
    M_in = jax.nn.softmax(jax.random.normal(keys[1], (N_cs, N_ll)), axis=-1)
    M_out = jax.nn.softmax(jax.random.normal(keys[2], (N_ll, N_cs)), axis=-1)

    # static fields
    lsm = (jax.random.uniform(keys[3], (1, 6, F, F)) > 0.5).astype(jnp.float32)
    topo = jax.random.uniform(keys[4], (1, 6, F, F)) * 5000.0
    longrid = jax.random.uniform(keys[5], (6, F, F), minval=-180.0, maxval=180.0)
    latgrid = jax.random.uniform(keys[6], (6, F, F), minval=-90.0, maxval=90.0)

    # stand-in DLWP model parameters: 1x1 conv  C_in -> C_out
    c_in = t * (chan + 1) + 2        # 18
    c_out = 2 * chan                 # 14
    W = jax.random.normal(keys[7], (c_out, c_in), jnp.float32) * 0.1
    b = jax.random.normal(keys[8], (c_out,), jnp.float32) * 0.01

    wrapper = DLWPWrapperPallas(W, b, lsm, longrid, latgrid, topo, M_in, M_out, F)

    fwd = jax.jit(lambda xx, th: wrapper.forward(xx, th, nlat, nlon))
    y = fwd(x, time_hours)
    y = jax.block_until_ready(y)

    assert y.shape == (bs, 2, chan, nlat, nlon), y.shape
    assert jnp.all(jnp.isfinite(y))

    # Validate the bf16-streaming Pallas path against a pure f32 reference.
    y_ref = reference_forward(x, jnp.float32(time_hours), M_in, M_out, W, b,
                              lsm, longrid, latgrid, topo, F, nlat, nlon)
    y_ref = jax.block_until_ready(y_ref)
    max_err = float(jnp.max(jnp.abs(y - y_ref)))
    assert jnp.allclose(y, y_ref, rtol=5e-2, atol=3e-2), max_err

    print("KERNEL_OK")
</pallas_src>

<mosaic_0001>
module attributes {stable_mosaic.version = 11 : i64} {
  func.func @_mm_kernel(%arg0: i32, %arg1: i32, %arg2: i32, %arg3: memref<32x256xbf16, #tpu.memory_space<vmem>>, %arg4: memref<256x384xbf16, #tpu.memory_space<vmem>>, %arg5: memref<32x384xf32, #tpu.memory_space<vmem>>, %arg6: memref<32x384xf32, #tpu.memory_space<vmem>>) attributes {dimension_semantics = [#tpu.dimension_semantics<parallel>, #tpu.dimension_semantics<parallel>, #tpu.dimension_semantics<arbitrary>], iteration_bounds = array<i64: 1, 1, 1>, scalar_prefetch = 0 : i64, scratch_operands = 1 : i64, tpu.core_type = #tpu.core_type<tc>, window_params = [{transform_indices = @transform_0, window_bounds = array<i64: 32, 256>}, {transform_indices = @transform_1, window_bounds = array<i64: 256, 384>}, {transform_indices = @transform_2, window_bounds = array<i64: 32, 384>}]} {
    %c0_i32 = arith.constant 0 : i32
    %0 = arith.cmpi eq, %arg2, %c0_i32 : i32
    %1 = arith.extui %0 : i1 to i32
    %c0_i32_0 = arith.constant 0 : i32
    %2 = arith.cmpi ne, %1, %c0_i32_0 : i32
    scf.if %2 {
      %cst_10 = arith.constant 0.000000e+00 : f32
      %12 = vector.broadcast %cst_10 : f32 to vector<32x384xf32>
      %c0_11 = arith.constant 0 : index
      %c0_12 = arith.constant 0 : index
      %13 = vector.load %arg6[%c0_11, %c0_12] : memref<32x384xf32, #tpu.memory_space<vmem>>, vector<32x384xf32>
      tpu.vector_store %arg6[%c0_11, %c0_12], %12 {strides = array<i32>} : memref<32x384xf32, #tpu.memory_space<vmem>>, vector<32x384xf32>,
    } else {
    }
    %c0 = arith.constant 0 : index
    %c0_1 = arith.constant 0 : index
    %3 = vector.load %arg6[%c0, %c0_1] : memref<32x384xf32, #tpu.memory_space<vmem>>, vector<32x384xf32>
    %c0_2 = arith.constant 0 : index
    %c0_3 = arith.constant 0 : index
    %4 = vector.load %arg3[%c0_2, %c0_3] : memref<32x256xbf16, #tpu.memory_space<vmem>>, vector<32x256xbf16>
    %c0_4 = arith.constant 0 : index
    %c0_5 = arith.constant 0 : index
    %5 = vector.load %arg4[%c0_4, %c0_5] : memref<256x384xbf16, #tpu.memory_space<vmem>>, vector<256x384xbf16>
    %cst = arith.constant dense<0.000000e+00> : vector<32x384xf32>
    %6 = tpu.matmul %4, %5, %cst {dimension_numbers = #tpu.dot_dimension_numbers<[1], [0], [0], [1], [0, 0, 1, 1], [], []>} : vector<32x256xbf16>, vector<256x384xbf16>, vector<32x384xf32> -> vector<32x384xf32>
    %7 = arith.addf %3, %6 : vector<32x384xf32>
    %c0_6 = arith.constant 0 : index
    %c0_7 = arith.constant 0 : index
    %8 = vector.load %arg6[%c0_6, %c0_7] : memref<32x384xf32, #tpu.memory_space<vmem>>, vector<32x384xf32>
    tpu.vector_store %arg6[%c0_6, %c0_7], %7 {strides = array<i32>} : memref<32x384xf32, #tpu.memory_space<vmem>>, vector<32x384xf32>,
    %c0_i32_8 = arith.constant 0 : i32
    %9 = arith.cmpi eq, %arg2, %c0_i32_8 : i32
    %10 = arith.extui %9 : i1 to i32
    %c0_i32_9 = arith.constant 0 : i32
    %11 = arith.cmpi ne, %10, %c0_i32_9 : i32
    scf.if %11 {
      %c0_10 = arith.constant 0 : index
      %c0_11 = arith.constant 0 : index
      %12 = vector.load %arg6[%c0_10, %c0_11] : memref<32x384xf32, #tpu.memory_space<vmem>>, vector<32x384xf32>
      %c0_12 = arith.constant 0 : index
      %c0_13 = arith.constant 0 : index
      %13 = vector.load %arg5[%c0_12, %c0_13] : memref<32x384xf32, #tpu.memory_space<vmem>>, vector<32x384xf32>
      tpu.vector_store %arg5[%c0_12, %c0_13], %12 {strides = array<i32>} : memref<32x384xf32, #tpu.memory_space<vmem>>, vector<32x384xf32>,
    } else {
    }
    return
  }
  func.func @transform_0(%arg0: i32, %arg1: i32, %arg2: i32) -> (i32, i32) {
    %c0_i32 = arith.constant 0 : i32
    return %arg0, %arg2 : i32, i32
  }
  func.func @transform_1(%arg0: i32, %arg1: i32, %arg2: i32) -> (i32, i32) {
    %c0_i32 = arith.constant 0 : i32
    return %arg2, %arg1 : i32, i32
  }
  func.func @transform_2(%arg0: i32, %arg1: i32, %arg2: i32) -> (i32, i32) {
    %c0_i32 = arith.constant 0 : i32
    return %arg0, %arg1 : i32, i32
  }
}

module attributes {stable_mosaic.version = 11 : i64} {
  func.func @_conv1x1_kernel(%arg0: i32, %arg1: memref<1x18x384xf32, #tpu.memory_space<vmem>>, %arg2: memref<14x18xf32, #tpu.memory_space<vmem>>, %arg3: memref<14x1xf32, #tpu.memory_space<vmem>>, %arg4: memref<1x14x384xf32, #tpu.memory_space<vmem>>) attributes {dimension_semantics = [#tpu.dimension_semantics<parallel>], iteration_bounds = array<i64: 2>, scalar_prefetch = 0 : i64, scratch_operands = 0 : i64, tpu.core_type = #tpu.core_type<tc>, window_params = [{transform_indices = @transform_0, window_bounds = array<i64: 1, 18, 384>}, {pipeline_mode = #tpu.pipeline_mode<synchronous>, transform_indices = @transform_1, window_bounds = array<i64: 14, 18>}, {pipeline_mode = #tpu.pipeline_mode<synchronous>, transform_indices = @transform_2, window_bounds = array<i64: 14, 1>}, {transform_indices = @transform_3, window_bounds = array<i64: 1, 14, 384>}]} {
    %c0 = arith.constant 0 : index
    %c0_0 = arith.constant 0 : index
    %0 = vector.load %arg2[%c0, %c0_0] : memref<14x18xf32, #tpu.memory_space<vmem>>, vector<14x18xf32>
    %c0_1 = arith.constant 0 : index
    %c0_2 = arith.constant 0 : index
    %c0_3 = arith.constant 0 : index
    %1 = vector.load %arg1[%c0_1, %c0_2, %c0_3] : memref<1x18x384xf32, #tpu.memory_space<vmem>>, vector<1x18x384xf32>
    %2 = vector.shape_cast %1 : vector<1x18x384xf32> to vector<18x384xf32>
    %cst = arith.constant dense<0.000000e+00> : vector<14x384xf32>
    %3 = tpu.matmul %0, %2, %cst {dimension_numbers = #tpu.dot_dimension_numbers<[1], [0], [0], [1], [0, 0, 1, 1], [], []>} : vector<14x18xf32>, vector<18x384xf32>, vector<14x384xf32> -> vector<14x384xf32>
    %c0_4 = arith.constant 0 : index
    %c0_5 = arith.constant 0 : index
    %4 = vector.load %arg3[%c0_4, %c0_5] : memref<14x1xf32, #tpu.memory_space<vmem>>, vector<14x1xf32>
    %5 = vector.broadcast %4 : vector<14x1xf32> to vector<14x384xf32>
    %6 = arith.addf %3, %5 : vector<14x384xf32>
    %c0_6 = arith.constant 0 : index
    %c0_7 = arith.constant 0 : index
    %c0_8 = arith.constant 0 : index
    %7 = vector.load %arg4[%c0_6, %c0_7, %c0_8] : memref<1x14x384xf32, #tpu.memory_space<vmem>>, vector<1x14x384xf32>
    %8 = vector.shape_cast %7 : vector<1x14x384xf32> to vector<14x384xf32>
    %9 = vector.shape_cast %6 : vector<14x384xf32> to vector<1x14x384xf32>
    tpu.vector_store %arg4[%c0_6, %c0_7, %c0_8], %9 {strides = array<i32>} : memref<1x14x384xf32, #tpu.memory_space<vmem>>, vector<1x14x384xf32>,
    return
  }
  func.func @transform_0(%arg0: i32) -> (i32, i32, i32) {
    %c0_i32 = arith.constant 0 : i32
    %c0_i32_0 = arith.constant 0 : i32
    %c0_i32_1 = arith.constant 0 : i32
    return %arg0, %c0_i32, %c0_i32_0 : i32, i32, i32
  }
  func.func @transform_1(%arg0: i32) -> (i32, i32) {
    %c0_i32 = arith.constant 0 : i32
    %c0_i32_0 = arith.constant 0 : i32
    %c0_i32_1 = arith.constant 0 : i32
    return %c0_i32, %c0_i32_0 : i32, i32
  }
  func.func @transform_2(%arg0: i32) -> (i32, i32) {
    %c0_i32 = arith.constant 0 : i32
    %c0_i32_0 = arith.constant 0 : i32
    %c0_i32_1 = arith.constant 0 : i32
    return %c0_i32, %c0_i32_0 : i32, i32
  }
  func.func @transform_3(%arg0: i32) -> (i32, i32, i32) {
    %c0_i32 = arith.constant 0 : i32
    %c0_i32_0 = arith.constant 0 : i32
    %c0_i32_1 = arith.constant 0 : i32
    return %arg0, %c0_i32, %c0_i32_0 : i32, i32, i32
  }
}

module attributes {stable_mosaic.version = 11 : i64} {
  func.func @_mm_kernel_lhs_resident(%arg0: i32, %arg1: i32, %arg2: i32, %arg3: memref<32x384xbf16, #tpu.memory_space<vmem>>, %arg4: memref<384x256xbf16, #tpu.memory_space<vmem>>, %arg5: memref<32x256xf32, #tpu.memory_space<vmem>>, %arg6: memref<32x256xf32, #tpu.memory_space<vmem>>) attributes {dimension_semantics = [#tpu.dimension_semantics<parallel>, #tpu.dimension_semantics<parallel>, #tpu.dimension_semantics<arbitrary>], iteration_bounds = array<i64: 1, 1, 1>, scalar_prefetch = 0 : i64, scratch_operands = 1 : i64, tpu.core_type = #tpu.core_type<tc>, window_params = [{transform_indices = @transform_0, window_bounds = array<i64: 32, 384>}, {transform_indices = @transform_1, window_bounds = array<i64: 384, 256>}, {transform_indices = @transform_2, window_bounds = array<i64: 32, 256>}]} {
    %c0_i32 = arith.constant 0 : i32
    %0 = arith.cmpi eq, %arg2, %c0_i32 : i32
    %1 = arith.extui %0 : i1 to i32
    %c0_i32_0 = arith.constant 0 : i32
    %2 = arith.cmpi ne, %1, %c0_i32_0 : i32
    scf.if %2 {
      %cst_9 = arith.constant 0.000000e+00 : f32
      %15 = vector.broadcast %cst_9 : f32 to vector<32x256xf32>
      %c0_10 = arith.constant 0 : index
      %c0_11 = arith.constant 0 : index
      %16 = vector.load %arg6[%c0_10, %c0_11] : memref<32x256xf32, #tpu.memory_space<vmem>>, vector<32x256xf32>
      tpu.vector_store %arg6[%c0_10, %c0_11], %15 {strides = array<i32>} : memref<32x256xf32, #tpu.memory_space<vmem>>, vector<32x256xf32>,
    } else {
    }
    %c384_i32 = arith.constant 384 : i32
    %3 = arith.muli %arg2, %c384_i32 : i32
    %4 = tpu.assume_multiple %3, 128 : i32
    %c0 = arith.constant 0 : index
    %c0_1 = arith.constant 0 : index
    %5 = vector.load %arg6[%c0, %c0_1] : memref<32x256xf32, #tpu.memory_space<vmem>>, vector<32x256xf32>
    %c0_2 = arith.constant 0 : index
    %6 = arith.index_cast %4 : i32 to index
    %7 = vector.load %arg3[%c0_2, %6] : memref<32x384xbf16, #tpu.memory_space<vmem>>, vector<32x384xbf16>
    %c0_3 = arith.constant 0 : index
    %c0_4 = arith.constant 0 : index
    %8 = vector.load %arg4[%c0_3, %c0_4] : memref<384x256xbf16, #tpu.memory_space<vmem>>, vector<384x256xbf16>
    %cst = arith.constant dense<0.000000e+00> : vector<32x256xf32>
    %9 = tpu.matmul %7, %8, %cst {dimension_numbers = #tpu.dot_dimension_numbers<[1], [0], [0], [1], [0, 0, 1, 1], [], []>} : vector<32x384xbf16>, vector<384x256xbf16>, vector<32x256xf32> -> vector<32x256xf32>
    %10 = arith.addf %5, %9 : vector<32x256xf32>
    %c0_5 = arith.constant 0 : index
    %c0_6 = arith.constant 0 : index
    %11 = vector.load %arg6[%c0_5, %c0_6] : memref<32x256xf32, #tpu.memory_space<vmem>>, vector<32x256xf32>
    tpu.vector_store %arg6[%c0_5, %c0_6], %10 {strides = array<i32>} : memref<32x256xf32, #tpu.memory_space<vmem>>, vector<32x256xf32>,
    %c0_i32_7 = arith.constant 0 : i32
    %12 = arith.cmpi eq, %arg2, %c0_i32_7 : i32
    %13 = arith.extui %12 : i1 to i32
    %c0_i32_8 = arith.constant 0 : i32
    %14 = arith.cmpi ne, %13, %c0_i32_8 : i32
    scf.if %14 {
      %c0_9 = arith.constant 0 : index
      %c0_10 = arith.constant 0 : index
      %15 = vector.load %arg6[%c0_9, %c0_10] : memref<32x256xf32, #tpu.memory_space<vmem>>, vector<32x256xf32>
      %c0_11 = arith.constant 0 : index
      %c0_12 = arith.constant 0 : index
      %16 = vector.load %arg5[%c0_11, %c0_12] : memref<32x256xf32, #tpu.memory_space<vmem>>, vector<32x256xf32>
      tpu.vector_store %arg5[%c0_11, %c0_12], %15 {strides = array<i32>} : memref<32x256xf32, #tpu.memory_space<vmem>>, vector<32x256xf32>,
    } else {
    }
    return
  }
  func.func @transform_0(%arg0: i32, %arg1: i32, %arg2: i32) -> (i32, i32) {
    %c0_i32 = arith.constant 0 : i32
    %c0_i32_0 = arith.constant 0 : i32
    return %arg0, %c0_i32 : i32, i32
  }
  func.func @transform_1(%arg0: i32, %arg1: i32, %arg2: i32) -> (i32, i32) {
    %c0_i32 = arith.constant 0 : i32
    return %arg2, %arg1 : i32, i32
  }
  func.func @transform_2(%arg0: i32, %arg1: i32, %arg2: i32) -> (i32, i32) {
    %c0_i32 = arith.constant 0 : i32
    return %arg0, %arg1 : i32, i32
  }
}

</mosaic_0001>

<bundles_post_ra>
// kernel: _lambda_.3
= control target key start
LH: loop header
LB: loop body
LE: loop exit
PB: predicated region body
PF: predicated region fallthrough
CT: control target
= control target key end

     0   :  { %s898_s1 = inlined_call_operand.vmem [shape: bf16[256,384], index: 1, kind: input, shape index: {}]   ;;  %s899_s0 = inlined_call_operand.vmem [shape: bf16[32,256], index: 0, kind: input, shape index: {}]   ;;  %s900_s2 = inlined_call_operand.vmem [shape: f32[32,384], index: 2, kind: output, shape index: {}]  }
   0x1   :  { %v621_v0 = vld [vmem:[%s898_s1 + $0x4] ss:$12 sps:$4 sm:$0xff]   ;;  %v623_v1 = vld [vmem:[%s898_s1] ss:$12 sps:$4 sm:$0xff]   ;;  %v624_v2 = vld [vmem:[%s898_s1 + $0x1c] ss:$12 sps:$4 sm:$0xff]  }
   0x2   :  { %384 = vmatprep.subr.bf16.mxu0 %v621_v0  ;;  %v626_v3 = vld [vmem:[%s898_s1 + $0x18] ss:$12 sps:$4 sm:$0xff]   ;;  %v627_v4 = vld [vmem:[%s898_s1 + $0x34] ss:$12 sps:$4 sm:$0xff]   ;;  %v629_v5 = vld [vmem:[%s898_s1 + $0x30] ss:$12 sps:$4 sm:$0xff]  }
   0x3   :  { %385 = vmatpush1.bf16.msra.mxu0 %v623_v1  ;;  %v630_v6 = vld [vmem:[%s898_s1 + $0x4c] ss:$12 sps:$4 sm:$0xff]   ;;  %v642_v7 = vld [vmem:[%s898_s1 + $0xc8] ss:$12 sps:$4 sm:$0xff]   ;;  %v633_v9 = vld [vmem:[%s898_s1 + $0x64] ss:$12 sps:$4 sm:$0xff]  }
   0x4   :  { %386 = vmatprep.subr.bf16.mxu0 %v624_v2  ;;  %v632_v8 = vld [vmem:[%s898_s1 + $0x48] ss:$12 sps:$4 sm:$0xff]   ;;  %593 = vmatprep.subr.bf16.mxu1 %v642_v7  ;;  %v647_v11 = vld [vmem:[%s898_s1 + $0xe0] ss:$12 sps:$4 sm:$0xff]   ;;  %v652_v15 = vld [vmem:[%s898_s1 + $0xf8] ss:$12 sps:$4 sm:$0xff]  }
   0x5   :  { %v645_v10 = vld [vmem:[%s898_s1 + $0x8] ss:$12 sps:$4 sm:$0xff]   ;;  %v635_v12 = vld [vmem:[%s898_s1 + $0x60] ss:$12 sps:$4 sm:$0xff]   ;;  %v638_v16 = vld [vmem:[%s898_s1 + $0x78] ss:$12 sps:$4 sm:$0xff]  }
   0x6   :  { %594 = vmatpush3.bf16.msra.mxu1 %v645_v10  ;;  %v636_v13 = vld [vmem:[%s898_s1 + $0x7c] ss:$12 sps:$4 sm:$0xff]   ;;  %v650_v14 = vld [vmem:[%s898_s1 + $0x20] ss:$12 sps:$4 sm:$0xff]   ;;  %v655_v17 = vld [vmem:[%s898_s1 + $0x38] ss:$12 sps:$4 sm:$0xff]  }
   0x7   :  { %387 = vmatpush1.bf16.msra.mxu0 %v626_v3  ;;  %595 = vmatprep.subr.bf16.mxu1 %v647_v11  ;;  %v639_v18 = vld [vmem:[%s898_s1 + $0x94] ss:$12 sps:$4 sm:$0xff]   ;;  %v657_v19 = vld [vmem:[%s898_s1 + $0x110] ss:$12 sps:$4 sm:$0xff]   ;;  %v643_v23 = vld [vmem:[%s898_s1 + $0xac] ss:$12 sps:$4 sm:$0xff]  }
   0x8   :  { %388 = vmatprep.subr.bf16.mxu0 %v627_v4  ;;  %v641_v20 = vld [vmem:[%s898_s1 + $0x90] ss:$12 sps:$4 sm:$0xff]   ;;  %v662_v22 = vld [vmem:[%s898_s1 + $0x128] ss:$12 sps:$4 sm:$0xff]   ;;  %v667_v26 = vld [vmem:[%s898_s1 + $0x140] ss:$12 sps:$4 sm:$0xff]  }
   0x9   :  { %v660_v21 = vld [vmem:[%s898_s1 + $0x50] ss:$12 sps:$4 sm:$0xff]   ;;  %v646_v24 = vld [vmem:[%s898_s1 + $0xa8] ss:$12 sps:$4 sm:$0xff]   ;;  %v651_v28 = vld [vmem:[%s898_s1 + $0xc0] ss:$12 sps:$4 sm:$0xff]  }
   0xa   :  { %596 = vmatpush3.bf16.msra.mxu1 %v650_v14  ;;  %v665_v25 = vld [vmem:[%s898_s1 + $0x68] ss:$12 sps:$4 sm:$0xff]   ;;  %v648_v27 = vld [vmem:[%s898_s1 + $0xc4] ss:$12 sps:$4 sm:$0xff]   ;;  %v670_v29 = vld [vmem:[%s898_s1 + $0x80] ss:$12 sps:$4 sm:$0xff]  }
   0xb   :  { %389 = vmatpush1.bf16.msra.mxu0 %v629_v5  ;;  %597 = vmatprep.subr.bf16.mxu1 %v652_v15  ;;  %v672_v30 = vld [vmem:[%s898_s1 + $0x158] ss:$12 sps:$4 sm:$0xff]   ;;  %v653_v31 = vld [vmem:[%s898_s1 + $0xdc] ss:$12 sps:$4 sm:$0xff]   ;;  %v658_v35 = vld [vmem:[%s898_s1 + $0xf4] ss:$12 sps:$4 sm:$0xff]  }
   0xc   :  { %390 = vmatprep.subr.bf16.mxu0 %v630_v6  ;;  %v675_v32 = vld [vmem:[%s898_s1 + $0x98] ss:$12 sps:$4 sm:$0xff]   ;;  %v677_v34 = vld [vmem:[%s898_s1 + $0x170] ss:$12 sps:$4 sm:$0xff]   ;;  %v682_v40 = vld [vmem:[%s899_s0] ss:$8 sps:$4 sm:$0xff]  }
   0xd   :  { %v656_v33 = vld [vmem:[%s898_s1 + $0xd8] ss:$12 sps:$4 sm:$0xff]   ;;  %v680_v37 = vld [vmem:[%s898_s1 + $0xb0] ss:$12 sps:$4 sm:$0xff]   ;;  %v666_v42 = vld [vmem:[%s898_s1 + $0x108] ss:$12 sps:$4 sm:$0xff]  }
   0xe   :  { %598 = vmatpush3.bf16.msra.mxu1 %v655_v17  ;;  %v684_v36 = vld [vmem:[%s899_s0 + $0x4] ss:$8 sps:$4 sm:$0xff]   ;;  %v661_v38 = vld [vmem:[%s898_s1 + $0xf0] ss:$12 sps:$4 sm:$0xff]   ;;  %v678_v48 = vld [vmem:[%s898_s1 + $0x154] ss:$12 sps:$4 sm:$0xff]  }
   0xf   :  { %391 = vmatpush1.bf16.msra.mxu0 %v632_v8  ;;  %599 = vmatprep.subr.bf16.mxu1 %v657_v19  ;;  %v663_v39 = vld [vmem:[%s898_s1 + $0x10c] ss:$12 sps:$4 sm:$0xff]   ;;  %v688_v41 = vld [vmem:[%s899_s0 + $0x14] ss:$8 sps:$4 sm:$0xff]   ;;  %v668_v43 = vld [vmem:[%s898_s1 + $0x124] ss:$12 sps:$4 sm:$0xff]  }
  0x10   :  { %392 = vmatprep.subr.bf16.mxu0 %v633_v9  ;;  %469 = vmatprep.mubr.bf16.mxu1 %v684_v36  ;;  %v671_v44 = vld [vmem:[%s898_s1 + $0x120] ss:$12 sps:$4 sm:$0xff]   ;;  %v673_v45 = vld [vmem:[%s898_s1 + $0x13c] ss:$12 sps:$4 sm:$0xff]   ;;  %v690_v46 = vld [vmem:[%s899_s0 + $0x10] ss:$8 sps:$4 sm:$0xff]  }
  0x11   :  { %416 = vmatprep.mubr.bf16.mxu0 %v684_v36  ;;  %v676_v47 = vld [vmem:[%s898_s1 + $0x138] ss:$12 sps:$4 sm:$0xff]   ;;  %v681_v49 = vld [vmem:[%s898_s1 + $0x150] ss:$12 sps:$4 sm:$0xff]   ;;  %v687_v51 = vld [vmem:[%s898_s1 + $0x168] ss:$12 sps:$4 sm:$0xff]  }
  0x12   :  { %600 = vmatpush3.bf16.msra.mxu1 %v660_v21  ;;  %v685_v50 = vld [vmem:[%s898_s1 + $0x16c] ss:$12 sps:$4 sm:$0xff]  }
  0x13   :  { %393 = vmatpush1.bf16.msra.mxu0 %v635_v12  ;;  %601 = vmatprep.subr.bf16.mxu1 %v662_v22 }
  0x14   :  { %394 = vmatprep.subr.bf16.mxu0 %v636_v13 }
  0x16   :  { %602 = vmatpush3.bf16.msra.mxu1 %v665_v25 }
  0x17   :  { %395 = vmatpush1.bf16.msra.mxu0 %v638_v16  ;;  %603 = vmatprep.subr.bf16.mxu1 %v667_v26 }
  0x18   :  { %396 = vmatprep.subr.bf16.mxu0 %v639_v18 }
  0x1a   :  { %604 = vmatpush3.bf16.msra.mxu1 %v670_v29 }
  0x1b   :  { %397 = vmatpush1.bf16.msra.mxu0 %v641_v20  ;;  %605 = vmatprep.subr.bf16.mxu1 %v672_v30 }
  0x1c   :  { %398 = vmatprep.subr.bf16.mxu0 %v643_v23 }
  0x1e   :  { %606 = vmatpush3.bf16.msra.mxu1 %v675_v32 }
  0x1f   :  { %399 = vmatpush1.bf16.msra.mxu0 %v646_v24  ;;  %607 = vmatprep.subr.bf16.mxu1 %v677_v34 }
  0x20   :  { %400 = vmatprep.subr.bf16.mxu0 %v648_v27 }
  0x22   :  { %608 = vmatpush3.bf16.msra.mxu1 %v680_v37 }
  0x23   :  { %401 = vmatpush1.bf16.msra.mxu0 %v651_v28 }
  0x24   :  { %402 = vmatprep.subr.bf16.mxu0 %v653_v31 }
  0x25   :  { %470 = vmatmul.mubr.bf16.vlgmr.msra.gmra.mrb[0].mxu1 %v682_v40 }
  0x26   :  { %477 = vmatprep.mubr.bf16.mxu1 %v688_v41 }
  0x27   :  { %403 = vmatpush1.bf16.msra.mxu0 %v656_v33 }
  0x28   :  { %404 = vmatprep.subr.bf16.mxu0 %v658_v35 }
  0x2b   :  { %405 = vmatpush1.bf16.msra.mxu0 %v661_v38 }
  0x2c   :  { %406 = vmatprep.subr.bf16.mxu0 %v663_v39 }
  0x2d   :  { %478 = vmatmul.mubr.bf16.gmra.mrb[4].mxu1 %v690_v46 }
  0x2f   :  { %407 = vmatpush1.bf16.msra.mxu0 %v666_v42 }
  0x30   :  { %408 = vmatprep.subr.bf16.mxu0 %v668_v43 }
  0x33   :  { %409 = vmatpush1.bf16.msra.mxu0 %v671_v44 }
  0x34   :  { %410 = vmatprep.subr.bf16.mxu0 %v673_v45 }
  0x37   :  { %411 = vmatpush1.bf16.msra.mxu0 %v676_v47 }
  0x38   :  { %412 = vmatprep.subr.bf16.mxu0 %v678_v48 }
  0x3b   :  { %413 = vmatpush1.bf16.msra.mxu0 %v681_v49 }
  0x3c   :  { %414 = vmatprep.subr.bf16.mxu0 %v685_v50 }
  0x3f   :  { %415 = vmatpush1.bf16.msra.mxu0 %v687_v51 }
  0x42   :  { %417 = vmatmul.mubr.bf16.vlgmr.msra.gmra.mrb[0].mxu0 %v682_v40 }
  0x43   :  { %426 = vmatprep.mubr.bf16.mxu0 %v688_v41 }
  0x4a   :  { %427 = vmatmul.mubr.bf16.gmra.mrb[4].mxu0 %v690_v46 }
  0xf8   :  { %v609_v52 = vpop.f32.mrb[0].mxu1 }
  0xf9   :  { %v610_v53 = vpop.f32.mrb[1].mxu1 }
  0xfa   :  { %v611_v54 = vadd.f32 %v610_v53, %v609_v52  ;;  %v612_v55 = vpop.f32.mrb[2].mxu1 }
  0xfb   :  { %v613_v56 = vpop.f32.mrb[3].mxu1 }
  0xfc   :  { %527 = vst [vmem:[%s900_s2 + $0x10] sm:$0xff] %v611_v54  ;;  %v614_v57 = vadd.f32 %v613_v56, %v612_v55 }
  0xfe   :  { %530 = vst [vmem:[%s900_s2 + $0x28] sm:$0xff] %v614_v57 }
 0x100   :  { %v615_v58 = vpop.f32.mrb[4].mxu1 }
 0x101   :  { %v616_v59 = vpop.f32.mrb[5].mxu1 }
 0x102   :  { %v617_v60 = vadd.f32 %v616_v59, %v615_v58  ;;  %v618_v61 = vpop.f32.mrb[6].mxu1 }
 0x103   :  { %v619_v62 = vpop.f32.mrb[7].mxu1 }
 0x104   :  { %533 = vst [vmem:[%s900_s2 + $0x40] sm:$0xff] %v617_v60  ;;  %v620_v63 = vadd.f32 %v619_v62, %v618_v61 }
 0x106   :  { %536 = vst [vmem:[%s900_s2 + $0x58] sm:$0xff] %v620_v63 }
 0x115   :  { %v418_v0 = vpop.f32.mrb[0].mxu0 }
 0x116   :  { %525 = vst [vmem:[%s900_s2] sm:$0xff] %v418_v0  ;;  %v420_v1 = vpop.f32.mrb[1].mxu0 }
 0x117   :  { %526 = vst [vmem:[%s900_s2 + $0x8] sm:$0xff] %v420_v1  ;;  %v422_v2 = vpop.f32.mrb[2].mxu0 }
 0x118   :  { %528 = vst [vmem:[%s900_s2 + $0x18] sm:$0xff] %v422_v2  ;;  %v424_v3 = vpop.f32.mrb[3].mxu0 }
 0x119   :  { %529 = vst [vmem:[%s900_s2 + $0x20] sm:$0xff] %v424_v3 }
 0x11d   :  { %v428_v4 = vpop.f32.mrb[4].mxu0 }
 0x11e   :  { %531 = vst [vmem:[%s900_s2 + $0x30] sm:$0xff] %v428_v4  ;;  %v430_v5 = vpop.f32.mrb[5].mxu0 }
 0x11f   :  { %532 = vst [vmem:[%s900_s2 + $0x38] sm:$0xff] %v430_v5  ;;  %v432_v6 = vpop.f32.mrb[6].mxu0 }
 0x120   :  { %534 = vst [vmem:[%s900_s2 + $0x48] sm:$0xff] %v432_v6  ;;  %v434_v7 = vpop.f32.mrb[7].mxu0 }
 0x121   :  { %535 = vst [vmem:[%s900_s2 + $0x50] sm:$0xff] %v434_v7 }

// kernel: _lambda_.4
= control target key start
LH: loop header
LB: loop body
LE: loop exit
PB: predicated region body
PF: predicated region fallthrough
CT: control target
= control target key end

     0   :  { %s505_s12 = smov 0   ;;  %s542_s0 = inlined_call_operand.vmem [shape: f32[2,18,384], index: 0, kind: input, shape index: {}]   ;;  %s543_s1 = inlined_call_operand.vmem [shape: f32[14,18], index: 1, kind: input, shape index: {}]   ;;  %s544_s2 = inlined_call_operand.vmem [shape: f32[14,1], index: 2, kind: input, shape index: {}]   ;;  %s545_s3 = inlined_call_operand.vmem [shape: f32[2,14,384], index: 3, kind: output, shape index: {}]  }
   0x1 LB: > { %s424_s13 = sadd.s32 4294967295, %s481_s12   ;;  %p428_p0 = scmp.ge.s32.totalorder %s481_s12, 1  ;;  %s481_s12 = sphi %s505_s12, %s13_s12  }
   0x2   : > { %p137_p1 = scmp.lt.s32.totalorder %s481_s12, 3 }
   0x4   : > { %p138_p2 = pnand %p428_p0, %p137_p1 }
   0x5   : > { %p161_p3 = scmp.lt.s32.totalorder (!%p138_p2), %s424_s13, 1  ;;  %v171_v0 = vld [vmem:[%s543_s1] sm:$0xff] (!%p138_p2)  ;;  %vm194_vm0 = vcmask (!%p138_p2), 146432   ;;  %v483_v1 = vmov (!%p138_p2), 0.0   ;;  %v484_v3 = vmov (!%p138_p2), 0   ;;  %vm201_vm1 = vcmask (!%p138_p2), 1041408  }
   0x6   : > { %141 = sbr.rel (%p138_p2) target bundleno = 246 (0xf6), region = 32  ;;  %275 = vmatprep.mubr.f32.mxu0 (!%p138_p2), %v483_v1  ;;  %451 = vmatprep.mubr.msk.f32.mxu1 (!%p138_p2), %vm194_vm0, %v171_v0  ;;  %v182_v2 = vld [vmem:[%s544_s2] sm:$0xff] (!%p138_p2)  ;;  %v183_v4 = vld [vmem:[%s544_s2 + $0x8] sm:$0x3f] (!%p138_p2) }
   0x7   : > { %474 = vset.pattern.permute.xlu0 (!%p138_p2), %v484_v3  ;;  %v172_v17 = vld [vmem:[%s543_s1 + $0x8] sm:$0x3f] (!%p138_p2) }
   0x8   : > { %186 = vperm.xlu0 (!%p138_p2), %474, %v182_v2  }
   0xc   : > { %191 = vperm.xlu0 (!%p138_p2), %474, %v183_v4  }
   0xd   : > { %s547_s13 = smov (!%p161_p3, %s424_s13), 1 }
   0xe   : > { %s462_s18 = smul.u32 72, %s547_s13 }
   0xf   : > { %s463_s26 = smul.u32 48, %s547_s13 }
  0x10   : > { %s165_s23 = scalar_lea.vmem %s542_s0, %s462_s18 }
  0x11   : > { %v174_v5 = vld [vmem:[%s165_s23 + $0x8] sm:$0xff]  ;;  %v177_v6 = vld [vmem:[%s165_s23 + $0x20] sm:$0xff]  ;;  %v175_v7 = vld [vmem:[%s165_s23 + $0x10] sm:$0xff]  ;;  %s170_s29 = scalar_lea.vmem %s545_s3, %s463_s26 }
  0x12   : > { %v454_v8 = vpack.c.bf16 %v177_v6, %v174_v5  ;;  %v178_v9 = vld [vmem:[%s165_s23 + $0x28] sm:$0xff]  ;;  %v173_v10 = vld [vmem:[%s165_s23] sm:$0xff]  ;;  %v176_v11 = vld [vmem:[%s165_s23 + $0x18] sm:$0xff] }
  0x13   : > { %v458_v12 = vpack.c.bf16 %v178_v9, %v175_v7  ;;  %v456_v13 = vpack.c.bf16 %v176_v11, %v173_v10  ;;  %v180_v14 = vld [vmem:[%s165_s23 + $0x38] sm:$0x3]  ;;  %v181_v15 = vld [vmem:[%s165_s23 + $0x40] sm:$0x3]  ;;  %v179_v16 = vld [vmem:[%s165_s23 + $0x30] sm:$0x3] }
  0x14   : > { %455 = vmatprep.subr.bf16.mxu0 %v454_v8 }
  0x15   : > { %459 = vmatprep.subr.bf16.mxu1 %v458_v12  ;;  %457 = vmatpush1.bf16.msra.mxu0 %v456_v13 }
  0x16   : > { %461 = vmatpush3.bf16.msra.mxu1 %v458_v12  ;;  %431 = vmatprep.subr.msk.mxu0 %vm201_vm1, %v180_v14 }
  0x17   : > { %449 = vmatprep.subr.msk.mxu1 %vm201_vm1, %v181_v15 }
  0x19   : > { %432 = vmatpush1.msk.msra.mxu0 %vm201_vm1, %v179_v16 }
  0x1a   : > { %450 = vmatpush3.msk.msra.mxu1 %vm201_vm1, %v181_v15  ;;  %433 = vmatmul.mubr.msk.f32.vlgmr.msra.gmra.mrb[0].mxu0 %vm194_vm0, %v171_v0 }
  0x1b   : > { %452 = vmatmul.mubr.msk.f32.vlgmr.msra.gmra.mrb[0].mxu1 %vm194_vm0, %v172_v17  ;;  %281 = vmatprep.mubr.f32.mxu0 %v483_v1 }
  0x1e   : > { %434 = vmatmul.mubr.msk.f32.gmra.mrb[2].mxu0 %vm194_vm0, %v172_v17 }
  0x87   : > { %v187_v18 = vpop.permute.xlu0 %186 }
  0x8b   : > { %v192_v19 = vpop.permute.xlu0 %191 }
  0xed   : > { %v277_v20 = vpop.f32.mrb[0].mxu0 }
  0xee   : > { %v278_v21 = vadd.f32 %v277_v20, %v187_v18  ;;  %v453_v22 = vpop.f32.mrb[0].mxu1  ;;  %v279_v23 = vpop.f32.mrb[1].mxu0 }
  0xef   : > { %v360_v24 = vadd.f32 %v453_v22, %v192_v19  ;;  %v280_v25 = vadd.f32 %v279_v23, %v187_v18  ;;  %v354_v26 = vpop.f32.mrb[1].mxu1 }
  0xf0   : > { %363 = vst [vmem:[%s170_s29] sm:$0xff] %v278_v21  ;;  %v355_v27 = vadd.f32 %v354_v26, %v187_v18 }
  0xf1   : > { %368 = vst [vmem:[%s170_s29 + $0x28] sm:$0x3f] %v360_v24  ;;  %364 = vst [vmem:[%s170_s29 + $0x8] sm:$0xff] %v280_v25  ;;  %v283_v28 = vpop.f32.mrb[2].mxu0 }
  0xf2   : > { %365 = vst [vmem:[%s170_s29 + $0x10] sm:$0xff] %v355_v27  ;;  %v284_v29 = vadd.f32 %v283_v28, %v192_v19  ;;  %v285_v30 = vpop.f32.mrb[3].mxu0 }
  0xf3   : > { %v286_v31 = vadd.f32 %v285_v30, %v192_v19 }
  0xf4   : > { %366 = vst [vmem:[%s170_s29 + $0x18] sm:$0x3f] %v284_v29 }
  0xf5   : > { %367 = vst [vmem:[%s170_s29 + $0x20] sm:$0x3f] %v286_v31 }
  0xf6 PF: > { %s13_s12 = sadd.s32 1, %s481_s12  }
  0xf7   : > { %p10_p4 = scmp.ge.s32.totalorder %s13_s12, 4  }
  0xf9   :  { %12 = sbr.rel (!%p10_p4) target bundleno = 1 (0x1), region = 62 }

// kernel: _lambda_.5
= control target key start
LH: loop header
LB: loop body
LE: loop exit
PB: predicated region body
PF: predicated region fallthrough
CT: control target
= control target key end

     0   :  { %v655_v1 = vmov 0   ;;  %s859_s1 = inlined_call_operand.vmem [shape: bf16[384,256], index: 1, kind: input, shape index: {}]   ;;  %s860_s0 = inlined_call_operand.vmem [shape: bf16[32,384], index: 0, kind: input, shape index: {}]   ;;  %s861_s2 = inlined_call_operand.vmem [shape: f32[32,256], index: 2, kind: output, shape index: {}]  }
   0x1   :  { %v575_v0 = vld [vmem:[%s859_s1 + $0x4] ss:$8 sps:$4 sm:$0xff]   ;;  %450 = vmatprep.mubr.bf16.mxu0 %v655_v1  ;;  %v577_v2 = vld [vmem:[%s859_s1] ss:$8 sps:$4 sm:$0xff]   ;;  %v578_v3 = vld [vmem:[%s859_s1 + $0x14] ss:$8 sps:$4 sm:$0xff]  }
   0x2   :  { %365 = vmatprep.subr.bf16.mxu1 %v575_v0  ;;  %v580_v4 = vld [vmem:[%s859_s1 + $0x10] ss:$8 sps:$4 sm:$0xff]   ;;  %v581_v5 = vld [vmem:[%s859_s1 + $0x24] ss:$8 sps:$4 sm:$0xff]   ;;  %v583_v6 = vld [vmem:[%s859_s1 + $0x20] ss:$8 sps:$4 sm:$0xff]  }
   0x3   :  { %366 = vmatpush1.bf16.msra.mxu1 %v577_v2  ;;  %v584_v7 = vld [vmem:[%s859_s1 + $0x34] ss:$8 sps:$4 sm:$0xff]   ;;  %v586_v8 = vld [vmem:[%s859_s1 + $0x30] ss:$8 sps:$4 sm:$0xff]   ;;  %v599_v9 = vld [vmem:[%s859_s1 + $0x104] ss:$8 sps:$4 sm:$0xff]  }
   0x4   :  { %367 = vmatprep.subr.bf16.mxu1 %v578_v3  ;;  %v601_v10 = vld [vmem:[%s859_s1 + $0x100] ss:$8 sps:$4 sm:$0xff]   ;;  %v587_v11 = vld [vmem:[%s859_s1 + $0x44] ss:$8 sps:$4 sm:$0xff]   ;;  %418 = vmatprep.subr.bf16.mxu0 %v599_v9  ;;  %v605_v12 = vld [vmem:[%s859_s1 + $0x114] ss:$8 sps:$4 sm:$0xff]  }
   0x5   :  { %419 = vmatpush1.bf16.msra.mxu0 %v601_v10  ;;  %v607_v13 = vld [vmem:[%s859_s1 + $0x110] ss:$8 sps:$4 sm:$0xff]   ;;  %v589_v14 = vld [vmem:[%s859_s1 + $0x40] ss:$8 sps:$4 sm:$0xff]   ;;  %v590_v15 = vld [vmem:[%s859_s1 + $0x54] ss:$8 sps:$4 sm:$0xff]  }
   0x6   :  { %420 = vmatprep.subr.bf16.mxu0 %v605_v12  ;;  %v611_v16 = vld [vmem:[%s859_s1 + $0x124] ss:$8 sps:$4 sm:$0xff]   ;;  %v613_v17 = vld [vmem:[%s859_s1 + $0x120] ss:$8 sps:$4 sm:$0xff]   ;;  %v592_v18 = vld [vmem:[%s859_s1 + $0x50] ss:$8 sps:$4 sm:$0xff]  }
   0x7   :  { %368 = vmatpush1.bf16.msra.mxu1 %v580_v4  ;;  %v617_v19 = vld [vmem:[%s859_s1 + $0x134] ss:$8 sps:$4 sm:$0xff]   ;;  %v593_v20 = vld [vmem:[%s859_s1 + $0x64] ss:$8 sps:$4 sm:$0xff]   ;;  %v619_v21 = vld [vmem:[%s859_s1 + $0x130] ss:$8 sps:$4 sm:$0xff]  }
   0x8   :  { %369 = vmatprep.subr.bf16.mxu1 %v581_v5  ;;  %v595_v22 = vld [vmem:[%s859_s1 + $0x60] ss:$8 sps:$4 sm:$0xff]   ;;  %v623_v23 = vld [vmem:[%s859_s1 + $0x144] ss:$8 sps:$4 sm:$0xff]   ;;  %v596_v24 = vld [vmem:[%s859_s1 + $0x74] ss:$8 sps:$4 sm:$0xff]  }
   0x9   :  { %421 = vmatpush1.bf16.msra.mxu0 %v607_v13  ;;  %v625_v25 = vld [vmem:[%s859_s1 + $0x140] ss:$8 sps:$4 sm:$0xff]   ;;  %v598_v26 = vld [vmem:[%s859_s1 + $0x70] ss:$8 sps:$4 sm:$0xff]   ;;  %v629_v27 = vld [vmem:[%s859_s1 + $0x154] ss:$8 sps:$4 sm:$0xff]  }
   0xa   :  { %422 = vmatprep.subr.bf16.mxu0 %v611_v16  ;;  %v602_v28 = vld [vmem:[%s859_s1 + $0x84] ss:$8 sps:$4 sm:$0xff]   ;;  %v631_v29 = vld [vmem:[%s859_s1 + $0x150] ss:$8 sps:$4 sm:$0xff]   ;;  %v604_v30 = vld [vmem:[%s859_s1 + $0x80] ss:$8 sps:$4 sm:$0xff]  }
   0xb   :  { %370 = vmatpush1.bf16.msra.mxu1 %v583_v6  ;;  %v635_v31 = vld [vmem:[%s859_s1 + $0x164] ss:$8 sps:$4 sm:$0xff]   ;;  %v608_v32 = vld [vmem:[%s859_s1 + $0x94] ss:$8 sps:$4 sm:$0xff]   ;;  %v610_v33 = vld [vmem:[%s859_s1 + $0x90] ss:$8 sps:$4 sm:$0xff]  }
   0xc   :  { %371 = vmatprep.subr.bf16.mxu1 %v584_v7  ;;  %v637_v34 = vld [vmem:[%s859_s1 + $0x160] ss:$8 sps:$4 sm:$0xff]   ;;  %v650_v35 = vld [vmem:[%s860_s0 + $0x4] ss:$12 sps:$4 sm:$0xff]   ;;  %v641_v36 = vld [vmem:[%s859_s1 + $0x174] ss:$8 sps:$4 sm:$0xff]  }
   0xd   :  { %423 = vmatpush1.bf16.msra.mxu0 %v613_v17  ;;  %v614_v37 = vld [vmem:[%s859_s1 + $0xa4] ss:$8 sps:$4 sm:$0xff]   ;;  %397 = vmatprep.mubr.bf16.mxu1 %v650_v35  ;;  %v643_v38 = vld [vmem:[%s859_s1 + $0x170] ss:$8 sps:$4 sm:$0xff]   ;;  %v616_v39 = vld [vmem:[%s859_s1 + $0xa0] ss:$8 sps:$4 sm:$0xff]  }
   0xe   :  { %424 = vmatprep.subr.bf16.mxu0 %v617_v19  ;;  %v620_v40 = vld [vmem:[%s859_s1 + $0xb4] ss:$8 sps:$4 sm:$0xff]   ;;  %v622_v42 = vld [vmem:[%s859_s1 + $0xb0] ss:$8 sps:$4 sm:$0xff]   ;;  %v626_v43 = vld [vmem:[%s859_s1 + $0xc4] ss:$8 sps:$4 sm:$0xff]  }
   0xf   :  { %372 = vmatpush1.bf16.msra.mxu1 %v586_v8  ;;  %v647_v41 = vld [vmem:[%s860_s0 + $0x8] ss:$12 sps:$4 sm:$0xff]   ;;  %v651_v46 = vld [vmem:[%s860_s0 + $0x20] ss:$12 sps:$4 sm:$0xff]   ;;  %v634_v47 = vld [vmem:[%s859_s1 + $0xd0] ss:$8 sps:$4 sm:$0xff]  }
  0x10   :  { %373 = vmatprep.subr.bf16.mxu1 %v587_v11  ;;  %v628_v44 = vld [vmem:[%s859_s1 + $0xc0] ss:$8 sps:$4 sm:$0xff]   ;;  %v632_v45 = vld [vmem:[%s859_s1 + $0xd4] ss:$8 sps:$4 sm:$0xff]   ;;  %v638_v48 = vld [vmem:[%s859_s1 + $0xe4] ss:$8 sps:$4 sm:$0xff]  }
  0x11   :  { %425 = vmatpush1.bf16.msra.mxu0 %v619_v21  ;;  %v640_v49 = vld [vmem:[%s859_s1 + $0xe0] ss:$8 sps:$4 sm:$0xff]   ;;  %v644_v50 = vld [vmem:[%s859_s1 + $0xf4] ss:$8 sps:$4 sm:$0xff]   ;;  %v646_v51 = vld [vmem:[%s859_s1 + $0xf0] ss:$8 sps:$4 sm:$0xff]  }
  0x12   :  { %426 = vmatprep.subr.bf16.mxu0 %v623_v23  ;;  %v648_v52 = vld [vmem:[%s860_s0] ss:$12 sps:$4 sm:$0xff]   ;;  %v652_v53 = vld [vmem:[%s860_s0 + $0x1c] ss:$12 sps:$4 sm:$0xff]   ;;  %v654_v54 = vld [vmem:[%s860_s0 + $0x18] ss:$12 sps:$4 sm:$0xff]  }
  0x13   :  { %374 = vmatpush1.bf16.msra.mxu1 %v589_v14 }
  0x14   :  { %375 = vmatprep.subr.bf16.mxu1 %v590_v15 }
  0x15   :  { %427 = vmatpush1.bf16.msra.mxu0 %v625_v25 }
  0x16   :  { %428 = vmatprep.subr.bf16.mxu0 %v629_v27 }
  0x17   :  { %376 = vmatpush1.bf16.msra.mxu1 %v592_v18 }
  0x18   :  { %377 = vmatprep.subr.bf16.mxu1 %v593_v20 }
  0x19   :  { %429 = vmatpush1.bf16.msra.mxu0 %v631_v29 }
  0x1a   :  { %430 = vmatprep.subr.bf16.mxu0 %v635_v31 }
  0x1b   :  { %378 = vmatpush1.bf16.msra.mxu1 %v595_v22 }
  0x1c   :  { %379 = vmatprep.subr.bf16.mxu1 %v596_v24 }
  0x1d   :  { %431 = vmatpush1.bf16.msra.mxu0 %v637_v34 }
  0x1e   :  { %432 = vmatprep.subr.bf16.mxu0 %v641_v36 }
  0x1f   :  { %380 = vmatpush1.bf16.msra.mxu1 %v598_v26 }
  0x20   :  { %381 = vmatprep.subr.bf16.mxu1 %v602_v28 }
  0x21   :  { %433 = vmatpush1.bf16.msra.mxu0 %v643_v38 }
  0x23   :  { %382 = vmatpush1.bf16.msra.mxu1 %v604_v30 }
  0x24   :  { %383 = vmatprep.subr.bf16.mxu1 %v608_v32  ;;  %451 = vmatmul.mubr.bf16.vlgmr.msra.gmra.mrb[0].mxu0 %v647_v41 }
  0x25   :  { %460 = vmatprep.mubr.bf16.mxu0 %v655_v1 }
  0x27   :  { %384 = vmatpush1.bf16.msra.mxu1 %v610_v33 }
  0x28   :  { %385 = vmatprep.subr.bf16.mxu1 %v614_v37 }
  0x2b   :  { %386 = vmatpush1.bf16.msra.mxu1 %v616_v39 }
  0x2c   :  { %387 = vmatprep.subr.bf16.mxu1 %v620_v40  ;;  %461 = vmatmul.mubr.bf16.gmra.mrb[4].mxu0 %v651_v46 }
  0x2f   :  { %388 = vmatpush1.bf16.msra.mxu1 %v622_v42 }
  0x30   :  { %389 = vmatprep.subr.bf16.mxu1 %v626_v43 }
  0x33   :  { %390 = vmatpush1.bf16.msra.mxu1 %v628_v44 }
  0x34   :  { %391 = vmatprep.subr.bf16.mxu1 %v632_v45 }
  0x37   :  { %392 = vmatpush1.bf16.msra.mxu1 %v634_v47 }
  0x38   :  { %393 = vmatprep.subr.bf16.mxu1 %v638_v48 }
  0x3b   :  { %394 = vmatpush1.bf16.msra.mxu1 %v640_v49 }
  0x3c   :  { %395 = vmatprep.subr.bf16.mxu1 %v644_v50 }
  0x3f   :  { %396 = vmatpush1.bf16.msra.mxu1 %v646_v51 }
  0x42   :  { %398 = vmatmul.mubr.bf16.vlgmr.msra.gmra.mrb[0].mxu1 %v648_v52 }
  0x43   :  { %407 = vmatprep.mubr.bf16.mxu1 %v652_v53 }
  0x4a   :  { %408 = vmatmul.mubr.bf16.gmra.mrb[4].mxu1 %v654_v54 }
  0xf7   :  { %v452_v55 = vpop.f32.mrb[0].mxu0 }
  0xf8   :  { %v454_v56 = vpop.f32.mrb[1].mxu0 }
  0xf9   :  { %v456_v57 = vpop.f32.mrb[2].mxu0 }
  0xfa   :  { %v458_v58 = vpop.f32.mrb[3].mxu0 }
  0xff   :  { %v462_v59 = vpop.f32.mrb[4].mxu0 }
 0x100   :  { %v464_v60 = vpop.f32.mrb[5].mxu0 }
 0x101   :  { %v466_v61 = vpop.f32.mrb[6].mxu0 }
 0x102   :  { %v468_v62 = vpop.f32.mrb[7].mxu0 }
 0x115   :  { %v399_v63 = vpop.f32.mrb[0].mxu1 }
 0x116   :  { %v453_v0 = vadd.f32 %v452_v55, %v399_v63  ;;  %v401_v1 = vpop.f32.mrb[1].mxu1 }
 0x117   :  { %v455_v2 = vadd.f32 %v454_v56, %v401_v1  ;;  %v403_v3 = vpop.f32.mrb[2].mxu1 }
 0x118   :  { %498 = vst [vmem:[%s861_s2] sm:$0xff] %v453_v0  ;;  %v457_v4 = vadd.f32 %v456_v57, %v403_v3  ;;  %v405_v5 = vpop.f32.mrb[3].mxu1 }
 0x119   :  { %499 = vst [vmem:[%s861_s2 + $0x8] sm:$0xff] %v455_v2  ;;  %v459_v6 = vadd.f32 %v458_v58, %v405_v5 }
 0x11a   :  { %500 = vst [vmem:[%s861_s2 + $0x10] sm:$0xff] %v457_v4 }
 0x11b   :  { %501 = vst [vmem:[%s861_s2 + $0x18] sm:$0xff] %v459_v6 }
 0x11d   :  { %v409_v7 = vpop.f32.mrb[4].mxu1 }
 0x11e   :  { %v463_v8 = vadd.f32 %v462_v59, %v409_v7  ;;  %v411_v9 = vpop.f32.mrb[5].mxu1 }
 0x11f   :  { %v465_v10 = vadd.f32 %v464_v60, %v411_v9  ;;  %v413_v11 = vpop.f32.mrb[6].mxu1 }
 0x120   :  { %502 = vst [vmem:[%s861_s2 + $0x20] sm:$0xff] %v463_v8  ;;  %v467_v12 = vadd.f32 %v466_v61, %v413_v11  ;;  %v415_v13 = vpop.f32.mrb[7].mxu1 }
 0x121   :  { %503 = vst [vmem:[%s861_s2 + $0x28] sm:$0xff] %v465_v10  ;;  %v469_v14 = vadd.f32 %v468_v62, %v415_v13 }
 0x122   :  { %504 = vst [vmem:[%s861_s2 + $0x30] sm:$0xff] %v467_v12 }
 0x123   :  { %505 = vst [vmem:[%s861_s2 + $0x38] sm:$0xff] %v469_v14 }

</bundles_post_ra>
